<compile_context>
chip_gen: v7x
topology: tpu7x:2x2x1
jax: 0.10.0
libtpu: 0.0.40
codegen_flags: <defaults>
</compile_context>

<pallas_src>
import functools

import jax
import jax.numpy as jnp
from jax.experimental import pallas as pl
from jax.experimental.pallas import tpu as pltpu

DROPOUT_P = 0.2


def _round_up(x, m):
    return ((x + m - 1) // m) * m


def _ffn_math(x_ref, w1_ref, b1_ref, w2_ref, b2_ref):
    # y = relu(x @ W1 + b1) @ W2 + b2 ; bf16 MXU operands, f32 accumulation.
    h = jnp.dot(x_ref[...], w1_ref[...], preferred_element_type=jnp.float32)
    h = jnp.maximum(h + b1_ref[...], 0.0)
    y = jnp.dot(h.astype(w2_ref.dtype), w2_ref[...],
                preferred_element_type=jnp.float32)
    return y + b2_ref[...]


def _ffn_eval_kernel(x_ref, w1_ref, b1_ref, w2_ref, b2_ref, o_ref):
    o_ref[...] = _ffn_math(x_ref, w1_ref, b1_ref, w2_ref, b2_ref).astype(o_ref.dtype)


def _ffn_train_kernel(x_ref, w1_ref, b1_ref, w2_ref, b2_ref, bits_ref, o_ref,
                      *, drop_threshold: int, keep_scale: float):
    y = _ffn_math(x_ref, w1_ref, b1_ref, w2_ref, b2_ref)
    # Inverted dropout via pure integer compare: drop iff bits < p * 2^32,
    # survivors scaled by 1/(1-p) via a single where(keep, scale, 0) multiply.
    keep = bits_ref[...] >= jnp.uint32(drop_threshold)
    o_ref[...] = (y * jnp.where(keep, jnp.float32(keep_scale),
                                jnp.float32(0.0))).astype(o_ref.dtype)


def feed_forward(x, w1, b1, w2, b2, *, training=False, rng_key=None,
                 dropout_p=DROPOUT_P, block_m=None,
                 compute_dtype=jnp.bfloat16):
    """x: (B, T, C). w1: (C, H), b1: (H,), w2: (H, C), b2: (C,). Returns (B, T, C)."""
    B, T, C = x.shape
    H = w1.shape[1]
    M = B * T

    # Fixed token tile (multiple of 8 sublanes). 256 keeps the MXU M-dim full on
    # v6e/v7x; tiny inputs just use one padded tile. (128 is a good choice on v5e.)
    if block_m is None:
        block_m = min(256, _round_up(M, 8))
    block_m = max(8, _round_up(block_m, 8))
    Mp = _round_up(M, block_m)
    grid_m = Mp // block_m

    # bf16 operands (f32 accumulation in the kernel): full MXU rate + half the
    # weight HBM/VMEM bytes. Biases stay f32 and are added to the f32 accumulator.
    x2 = x.reshape(M, C).astype(compute_dtype)
    if Mp != M:
        x2 = jnp.pad(x2, ((0, Mp - M), (0, 0)))
    w1c = w1.astype(compute_dtype)
    w2c = w2.astype(compute_dtype)
    b1_2d = b1.reshape(1, H).astype(jnp.float32)
    b2_2d = b2.reshape(1, C).astype(jnp.float32)

    inputs = [x2, w1c, b1_2d, w2c, b2_2d]
    in_specs = [
        pl.BlockSpec((block_m, C), lambda i: (i, 0)),   # x tile (pipelined)
        pl.BlockSpec((C, H), lambda i: (0, 0)),         # W1 (constant index -> resident)
        pl.BlockSpec((1, H), lambda i: (0, 0)),         # b1 (resident)
        pl.BlockSpec((H, C), lambda i: (0, 0)),         # W2 (resident)
        pl.BlockSpec((1, C), lambda i: (0, 0)),         # b2 (resident)
    ]

    csize = jnp.dtype(compute_dtype).itemsize
    osize = jnp.dtype(x.dtype).itemsize
    flops = 4 * Mp * C * H                        # two matmuls
    bytes_accessed = (Mp * C * csize              # x
                      + 2 * C * H * csize         # W1, W2
                      + (H + C) * 4               # biases
                      + Mp * C * osize)           # output

    if training and dropout_p > 0.0:
        if rng_key is None:
            rng_key = jax.random.PRNGKey(0)
        # Uniform u32 bits generated outside the kernel; streamed in per tile.
        bits = jax.random.bits(rng_key, (Mp, C), dtype=jnp.uint32)
        inputs.append(bits)
        in_specs.append(pl.BlockSpec((block_m, C), lambda i: (i, 0)))
        bytes_accessed += Mp * C * 4
        drop_threshold = min(int(round(dropout_p * (1 << 32))), (1 << 32) - 1)
        kernel = functools.partial(_ffn_train_kernel,
                                   drop_threshold=drop_threshold,
                                   keep_scale=1.0 / (1.0 - dropout_p))
    else:
        kernel = _ffn_eval_kernel

    # TODO(synk): for very large C (>=2048) add a K/N tiling over H with a VMEM f32
    # accumulator and single-buffered weight specs to fit v7x's 64 MiB VMEM.
    out = pl.pallas_call(
        kernel,
        out_shape=jax.ShapeDtypeStruct((Mp, C), x.dtype),
        grid=(grid_m,),
        in_specs=in_specs,
        out_specs=pl.BlockSpec((block_m, C), lambda i: (i, 0)),
        compiler_params=pltpu.CompilerParams(
            # Grid steps are fully independent (dropout bits arrive per tile), so
            # Mosaic may shard token tiles across both TensorCores on v7x.
            dimension_semantics=("parallel",),
            vmem_limit_bytes=32 * 1024 * 1024,
        ),
        cost_estimate=pl.CostEstimate(flops=flops, transcendentals=0,
                                      bytes_accessed=bytes_accessed),
    )(*inputs)

    return out[:M].reshape(B, T, C)


def _init_params(key, n_emb):
    """Deterministic init mimicking nn.Linear's uniform(-1/sqrt(fan_in), ...)."""
    hidden = 4 * n_emb
    k1, k2, k3, k4 = jax.random.split(key, 4)
    lim1 = 1.0 / (n_emb ** 0.5)
    lim2 = 1.0 / (hidden ** 0.5)
    w1 = jax.random.uniform(k1, (n_emb, hidden), jnp.float32, -lim1, lim1)
    b1 = jax.random.uniform(k2, (hidden,), jnp.float32, -lim1, lim1)
    w2 = jax.random.uniform(k3, (hidden, n_emb), jnp.float32, -lim2, lim2)
    b2 = jax.random.uniform(k4, (n_emb,), jnp.float32, -lim2, lim2)
    return w1, b1, w2, b2


if __name__ == "__main__":
    # Small shapes consistent with the module (n_emb scaled down from 384).
    B, T, n_emb = 2, 128, 128

    key = jax.random.PRNGKey(0)
    kx, kp, kd = jax.random.split(key, 3)
    x = jax.random.normal(kx, (B, T, n_emb), dtype=jnp.float32)
    w1, b1, w2, b2 = _init_params(kp, n_emb)

    # Eval mode (Dropout is identity): block_m=128 -> 2-step pipelined grid.
    y_eval = jax.block_until_ready(
        feed_forward(x, w1, b1, w2, b2, training=False, block_m=128))

    # Reference with matching bf16 operand rounding / f32 accumulation.
    xb = x.reshape(-1, n_emb).astype(jnp.bfloat16)
    h = jnp.maximum(jnp.dot(xb, w1.astype(jnp.bfloat16),
                            preferred_element_type=jnp.float32) + b1, 0.0)
    ref = jnp.dot(h.astype(jnp.bfloat16), w2.astype(jnp.bfloat16),
                  preferred_element_type=jnp.float32) + b2
    ref = ref.reshape(B, T, n_emb)
    assert float(jnp.max(jnp.abs(y_eval - ref))) < 2e-2

    # Train mode (inverted dropout active, bits streamed in per tile).
    y_train = jax.block_until_ready(
        feed_forward(x, w1, b1, w2, b2, training=True, rng_key=kd, block_m=128))
    assert y_train.shape == (B, T, n_emb)
    assert bool(jnp.all(jnp.isfinite(y_train)))
    zero_frac = float(jnp.mean(y_train == 0.0))
    assert 0.05 < zero_frac < 0.4, zero_frac

    print("KERNEL_OK")
</pallas_src>

<mosaic_0001>
module attributes {stable_mosaic.version = 11 : i64} {
  func.func @_ffn_eval_kernel(%arg0: i32, %arg1: memref<128x128xbf16, #tpu.memory_space<vmem>>, %arg2: memref<128x512xbf16, #tpu.memory_space<vmem>>, %arg3: memref<1x512xf32, #tpu.memory_space<vmem>>, %arg4: memref<512x128xbf16, #tpu.memory_space<vmem>>, %arg5: memref<1x128xf32, #tpu.memory_space<vmem>>, %arg6: memref<128x128xf32, #tpu.memory_space<vmem>>) attributes {dimension_semantics = [#tpu.dimension_semantics<parallel>], iteration_bounds = array<i64: 2>, scalar_prefetch = 0 : i64, scratch_operands = 0 : i64, tpu.core_type = #tpu.core_type<tc>, window_params = [{transform_indices = @transform_0, window_bounds = array<i64: 128, 128>}, {pipeline_mode = #tpu.pipeline_mode<synchronous>, transform_indices = @transform_1, window_bounds = array<i64: 128, 512>}, {pipeline_mode = #tpu.pipeline_mode<synchronous>, transform_indices = @transform_2, window_bounds = array<i64: 1, 512>}, {pipeline_mode = #tpu.pipeline_mode<synchronous>, transform_indices = @transform_3, window_bounds = array<i64: 512, 128>}, {pipeline_mode = #tpu.pipeline_mode<synchronous>, transform_indices = @transform_4, window_bounds = array<i64: 1, 128>}, {transform_indices = @transform_5, window_bounds = array<i64: 128, 128>}]} {
    %c0 = arith.constant 0 : index
    %c0_0 = arith.constant 0 : index
    %0 = vector.load %arg1[%c0, %c0_0] : memref<128x128xbf16, #tpu.memory_space<vmem>>, vector<128x128xbf16>
    %c0_1 = arith.constant 0 : index
    %c0_2 = arith.constant 0 : index
    %1 = vector.load %arg2[%c0_1, %c0_2] : memref<128x512xbf16, #tpu.memory_space<vmem>>, vector<128x512xbf16>
    %cst = arith.constant dense<0.000000e+00> : vector<128x512xf32>
    %2 = tpu.matmul %0, %1, %cst {dimension_numbers = #tpu.dot_dimension_numbers<[1], [0], [0], [1], [0, 0, 1, 1], [], []>} : vector<128x128xbf16>, vector<128x512xbf16>, vector<128x512xf32> -> vector<128x512xf32>
    %c0_3 = arith.constant 0 : index
    %c0_4 = arith.constant 0 : index
    %3 = vector.load %arg3[%c0_3, %c0_4] : memref<1x512xf32, #tpu.memory_space<vmem>>, vector<1x512xf32>
    %4 = vector.broadcast %3 : vector<1x512xf32> to vector<128x512xf32>
    %5 = arith.addf %2, %4 : vector<128x512xf32>
    %cst_5 = arith.constant 0.000000e+00 : f32
    %6 = vector.broadcast %cst_5 : f32 to vector<128x512xf32>
    %7 = arith.maximumf %5, %6 : vector<128x512xf32>
    %8 = arith.truncf %7 : vector<128x512xf32> to vector<128x512xbf16>
    %c0_6 = arith.constant 0 : index
    %c0_7 = arith.constant 0 : index
    %9 = vector.load %arg4[%c0_6, %c0_7] : memref<512x128xbf16, #tpu.memory_space<vmem>>, vector<512x128xbf16>
    %cst_8 = arith.constant dense<0.000000e+00> : vector<128x128xf32>
    %10 = tpu.matmul %8, %9, %cst_8 {dimension_numbers = #tpu.dot_dimension_numbers<[1], [0], [0], [1], [0, 0, 1, 1], [], []>} : vector<128x512xbf16>, vector<512x128xbf16>, vector<128x128xf32> -> vector<128x128xf32>
    %c0_9 = arith.constant 0 : index
    %c0_10 = arith.constant 0 : index
    %11 = vector.load %arg5[%c0_9, %c0_10] : memref<1x128xf32, #tpu.memory_space<vmem>>, vector<1x128xf32>
    %12 = vector.broadcast %11 : vector<1x128xf32> to vector<128x128xf32>
    %13 = arith.addf %10, %12 : vector<128x128xf32>
    %c0_11 = arith.constant 0 : index
    %c0_12 = arith.constant 0 : index
    %14 = vector.load %arg6[%c0_11, %c0_12] : memref<128x128xf32, #tpu.memory_space<vmem>>, vector<128x128xf32>
    tpu.vector_store %arg6[%c0_11, %c0_12], %13 {strides = array<i32>} : memref<128x128xf32, #tpu.memory_space<vmem>>, vector<128x128xf32>,
    return
  }
  func.func @transform_0(%arg0: i32) -> (i32, i32) {
    %c0_i32 = arith.constant 0 : i32
    %c0_i32_0 = arith.constant 0 : i32
    return %arg0, %c0_i32 : i32, i32
  }
  func.func @transform_1(%arg0: i32) -> (i32, i32) {
    %c0_i32 = arith.constant 0 : i32
    %c0_i32_0 = arith.constant 0 : i32
    %c0_i32_1 = arith.constant 0 : i32
    return %c0_i32, %c0_i32_0 : i32, i32
  }
  func.func @transform_2(%arg0: i32) -> (i32, i32) {
    %c0_i32 = arith.constant 0 : i32
    %c0_i32_0 = arith.constant 0 : i32
    %c0_i32_1 = arith.constant 0 : i32
    return %c0_i32, %c0_i32_0 : i32, i32
  }
  func.func @transform_3(%arg0: i32) -> (i32, i32) {
    %c0_i32 = arith.constant 0 : i32
    %c0_i32_0 = arith.constant 0 : i32
    %c0_i32_1 = arith.constant 0 : i32
    return %c0_i32, %c0_i32_0 : i32, i32
  }
  func.func @transform_4(%arg0: i32) -> (i32, i32) {
    %c0_i32 = arith.constant 0 : i32
    %c0_i32_0 = arith.constant 0 : i32
    %c0_i32_1 = arith.constant 0 : i32
    return %c0_i32, %c0_i32_0 : i32, i32
  }
  func.func @transform_5(%arg0: i32) -> (i32, i32) {
    %c0_i32 = arith.constant 0 : i32
    %c0_i32_0 = arith.constant 0 : i32
    return %arg0, %c0_i32 : i32, i32
  }
}

</mosaic_0001>

<bundles_post_ra>
// kernel: tpu_custom_call.1
= control target key start
LH: loop header
LB: loop body
LE: loop exit
PB: predicated region body
PF: predicated region fallthrough
CT: control target
= control target key end

     0   :  { %10 = vsyncpa [#allocation3], 0  ;;  %s2418_s0 = inlined_call_operand.hbm [shape: bf16[256,128], index: 0, kind: input, shape index: {}]   ;;  %s2419_s1 = inlined_call_operand.hbm [shape: bf16[128,512], index: 1, kind: input, shape index: {}]   ;;  %s2420_s2 = inlined_call_operand.vmem [shape: f32[1,512], index: 2, kind: input, shape index: {}]   ;;  %s2421_s3 = inlined_call_operand.hbm [shape: bf16[512,128], index: 3, kind: input, shape index: {}]   ;;  %s2422_s4 = inlined_call_operand.vmem [shape: f32[1,128], index: 4, kind: input, shape index: {}]   ;;  %s2423_s5 = inlined_call_operand.hbm [shape: f32[256,128], index: 5, kind: output, shape index: {}]  }
   0x1   :  { %12 = vsyncpa [#allocation3 + $0x1], 0 }
   0x2   :  { %13 = vsyncpa [#allocation6], 0 }
   0x3   :  { %14 = vsyncpa [#allocation4], 0 }
   0x4   :  { %16 = vsyncpa [#allocation4 + $0x1], 0  ;;  %s2036_s18 = smov 0   ;;  %s2038_s19 = smov 0  }
   0x5   :  { %s2040_s20 = smov 0   ;;  %s2042_s21 = smov 0  }
   0x6 LB: > { %s2057_s22 = sadd.s32 4294967295, %s1993_s21   ;;  %s1454_s23 = sadd.s32 4294967294, %s1993_s21   ;;  %s1993_s21 = sphi %s2042_s21, %s2443_s21   ;;  %s1989_s20 = sphi %s2040_s20, %s2442_s20   ;;  %s1985_s19 = sphi %s2038_s19, %s2441_s19   ;;  %s1981_s18 = sphi %s2036_s18, %s2440_s18  }
   0x7   : > { %p42_p0 = scmp.ne.s32.totalorder %s1985_s19, %s1981_s18  ;;  %p2424_p1 = scmp.eq.s32.totalorder %s2057_s22, 0 }
   0x8   : > { %p156_p3 = scmp.eq.s32.totalorder %s1454_s23, 1  ;;  %p1455_p5 = scmp.ge.s32.totalorder %s1993_s21, 1 }
   0x9   : > { %p2066_p4 = por %p2424_p1, %p42_p0  ;;  %p163_p7 = scmp.lt.s32.totalorder %s1993_s21, 3 }
   0xa   : > { %p2071_p6 = por %p156_p3, %p42_p0  ;;  %s1995_s27 = smov [#allocation5]  }
   0xb   : > { %s2427_s24 = scalar_select %p2066_p4, 1, 0 }
   0xc   : > { %s2428_s25 = scalar_select %p2071_p6, 1, 0 }
   0xd   : > { %p2076_p8 = pnand %p1455_p5, %p163_p7  ;;  %s175_s28 = sshll.u32 %s1995_s27, 4  ;;  %s2080_s28 = int_to_ptr.vmem [resolvable:$true] %s175_s28 }
   0xe   : > { %s1996_s30 = smov [#allocation7]   ;;  %s1837_s9 = scalar_lea.hbm %s2419_s1, 4096 }
   0xf   : > { %p1687_p9 = pneg %p2076_p8  ;;  %s191_s6 = sshll.u32 %s1996_s30, 4  ;;  %s2091_s6 = int_to_ptr.vmem [resolvable:$true] %s191_s6 }
  0x10   : > { %p1838_p12 = scmp.ne.s32.totalorder %s2419_s1, %s1837_s9  ;;  %p1844_p5 = scmp.lt.u32.totalorder %s1837_s9, %s2419_s1 }
  0x11   : > { %p2087_p11 = pnand %p1687_p9, %p2424_p1 }
  0x13   : > { %p1839_p13 = pneg %p2087_p11 }
  0x15   : > { %p1840_p0 = pnand %p1839_p13, %p1838_p12 }
  0x17   : > { %p1841_p3 = pneg %p1840_p0 }
  0x19   : > { %p1846_p7 = pnand %p1844_p5, %p1841_p3 }
  0x1b   : > { %1849 = shalt.err (!%p1846_p7)
}
  0x1c   : > { %s1850_s14 = scalar_lea.vmem %s2080_s28, 4096  ;;  %p1858_p2 = scmp.lt.s32.totalorder %s2080_s28, %s2080_s28 }
  0x1d   : > { %p1851_p9 = scmp.ne.s32.totalorder %s2080_s28, %s1850_s14  ;;  %p1859_p12 = scmp.lt.s32.totalorder %s1850_s14, %s1850_s14 }
  0x1f   : > { %p1853_p10 = pnand %p1851_p9, %p1839_p13  ;;  %p1860_p0 = por %p1859_p12, %p1858_p2 }
  0x21   : > { %p1854_p1 = pneg %p1853_p10 }
  0x23   : > { %p1861_p6 = pnand %p1860_p0, %p1854_p1 }
  0x25   : > { %1864 = shalt.err (!%p1861_p6)
}
  0x26   : > { %s1997_s15 = smov 256   ;;  %s1998_s16 = smov 16  }
  0x27   : > { %1690 = dma.hbm_to_vmem [thread:$0]  (!%p2087_p11), %s2419_s1, 4096, %s2080_s28, [#allocation6], %s1997_s15, %s1997_s15, %s1998_s16  }
  0x28   : > { %s1865_s7 = scalar_lea.hbm %s2421_s3, 4096 }
  0x29   : > { %p1866_p2 = scmp.ne.s32.totalorder %s2421_s3, %s1865_s7  ;;  %p1872_p10 = scmp.lt.u32.totalorder %s1865_s7, %s2421_s3 }
  0x2b   : > { %p1868_p1 = pnand %p1866_p2, %p1839_p13 }
  0x2d   : > { %p1869_p6 = pneg %p1868_p1 }
  0x2f   : > { %p1874_p3 = pnand %p1872_p10, %p1869_p6 }
  0x31   : > { %1877 = shalt.err (!%p1874_p3)
}
  0x32   : > { %s1878_s28 = scalar_lea.vmem %s2091_s6, 4096  ;;  %p1886_p12 = scmp.lt.s32.totalorder %s2091_s6, %s2091_s6 }
  0x33   : > { %p1879_p5 = scmp.ne.s32.totalorder %s2091_s6, %s1878_s28  ;;  %p1887_p0 = scmp.lt.s32.totalorder %s1878_s28, %s1878_s28 }
  0x35   : > { %p1881_p7 = pnand %p1879_p5, %p1839_p13  ;;  %p1888_p2 = por %p1887_p0, %p1886_p12 }
  0x37   : > { %p1882_p9 = pneg %p1881_p7 }
  0x39   : > { %p1889_p1 = pnand %p1888_p2, %p1882_p9 }
  0x3b   : > { %1892 = shalt.err (!%p1889_p1)
}
  0x3c   : > { %s1999_s12 = smov 64   ;;  %s2000_s13 = smov 4  }
  0x3d   : > { %1693 = dma.hbm_to_vmem [thread:$0]  (!%p2087_p11), %s2421_s3, 4096, %s2091_s6, [#allocation6], %s1999_s12, %s1999_s12, %s2000_s13  }
  0x3e   : > { %s2149_s16 = sadd.s32 1, %s1993_s21   ;;  %s29_s23 = sadd.s32 1, %s1989_s20 }
  0x3f   : > { %s26_s17 = ssub.s32 %s1993_s21, %s2149_s16  ;;  %p36_p6 = scmp.ne.s32.totalorder %s1989_s20, %s1985_s19 }
  0x40   : > { %p27_p13 = scmp.eq.s32.totalorder %s26_s17, 0  ;;  %p37_p10 = scmp.eq.s32.totalorder %s1993_s21, 0 }
  0x41   : > { %p2431_p5 = scmp.eq.s32.totalorder %s2057_s22, 1  ;;  %p1704_p9 = scmp.lt.s32.totalorder %s1993_s21, 2 }
  0x42   : > { %s2158_s27 = scalar_select %p27_p13, %s1989_s20, %s29_s23  }
  0x43   : > { %p38_p3 = por %p37_p10, %p36_p6  ;;  %p2162_p7 = por %p2431_p5, %p36_p6 }
  0x44   : > { %s208_s30 = sand.u32 1, %s1989_s20   ;;  %s1545_s6 = sshll.u32 %s1993_s21, 10 }
  0x45   : > { %s2432_s29 = scalar_select %p2162_p7, 1, 0 }
  0x46   : > { %s1459_s7 = sshll.u32 %s208_s30, 6  ;;  %s2172_s10 = scalar_lea.hbm %s2418_s0, %s1545_s6 }
  0x47   : > { %s212_s11 = scalar_lea.vmem [#allocation2], %s1459_s7  ;;  %p2176_p11 = pnand %p1704_p9, %p38_p3 }
  0x48   : > { %s219_s28 = sshll.u32 %s212_s11, 4  ;;  %s2180_s15 = scalar_lea.sflag [#allocation3], %s208_s30  ;;  %s2174_s28 = int_to_ptr.vmem [resolvable:$true] %s219_s28 }
  0x49   : > { %s1893_s17 = scalar_lea.hbm %s2172_s10, 1024  ;;  %p1895_p0 = pneg %p2176_p11 }
  0x4a   : > { %p1894_p12 = scmp.ne.s32.totalorder %s2172_s10, %s1893_s17  ;;  %s1898_s6 = scalar_lea.hbm %s2418_s0, 2048 }
  0x4b   : > { %p1899_p13 = scmp.lt.u32.totalorder %s2172_s10, %s2418_s0  ;;  %p1900_p6 = scmp.lt.u32.totalorder %s1898_s6, %s1893_s17 }
  0x4c   : > { %p1896_p2 = pnand %p1895_p0, %p1894_p12  ;;  %p1902_p3 = scmp.lt.u32.totalorder %s1893_s17, %s2172_s10 }
  0x4d   : > { %p1901_p10 = por %p1900_p6, %p1899_p13 }
  0x4e   : > { %p1897_p1 = pneg %p1896_p2 }
  0x4f   : > { %p1903_p5 = por %p1902_p3, %p1901_p10 }
  0x51   : > { %p1904_p9 = pnand %p1903_p5, %p1897_p1 }
  0x53   : > { %1907 = shalt.err (!%p1904_p9)
}
  0x54   : > { %s1908_s30 = scalar_lea.vmem %s2174_s28, 1024  ;;  %s2001_s11 = smov [#allocation2]  }
  0x55   : > { %p1909_p12 = scmp.ne.s32.totalorder %s2174_s28, %s1908_s30  ;;  %s1913_s23 = sshll.u32 %s2001_s11, 4  ;;  %s1914_s23 = int_to_ptr.vmem [resolvable:$false] %s1913_s23 }
  0x56   : > { %s1915_s7 = scalar_lea.vmem %s1914_s23, 2048  ;;  %p1916_p4 = scmp.lt.s32.totalorder %s2174_s28, %s1914_s23 }
  0x57   : > { %p1911_p2 = pnand %p1909_p12, %p1895_p0  ;;  %p1917_p13 = scmp.lt.s32.totalorder %s1915_s7, %s1908_s30 }
  0x59   : > { %p1912_p7 = pneg %p1911_p2  ;;  %p1918_p6 = por %p1917_p13, %p1916_p4 }
  0x5b   : > { %p1919_p10 = pnand %p1918_p6, %p1912_p7 }
  0x5d   : > { %1922 = shalt.err (!%p1919_p10)
}
  0x5e   : > { %1697 = dma.hbm_to_vmem [thread:$0]  (!%p2176_p11), %s2172_s10, 1024, %s2174_s28, %s2180_s15, %s1999_s12, %s1999_s12, %s2000_s13  }
  0x5f   : > { %231 = sbr.rel (%p2076_p8) target bundleno = 654 (0x28e), region = 40  ;;  %s2214_s17 = sand.u32 (!%p2076_p8), 1, %s1985_s19  }
  0x60   : > { %s1463_s6 = sshll.u32 (!%p2076_p8), %s2214_s17, 6  ;;  %s234_s8 = scalar_lea.sflag (!%p2076_p8), [#allocation3], %s2214_s17 }
  0x61   : > { %s2218_s9 = scalar_lea.vmem (!%p2076_p8), [#allocation2], %s1463_s6  ;;  %p2434_p4 = scmp.ne.s32.totalorder (!%p2076_p8), %s2427_s24, 0 }
  0x66   : > { %1968 = dma.done.wait (%p2434_p4), %s234_s8, 1024  }
  0x67   : > { %1970 = vsyncadd (%p2434_p4), %s234_s8, 4294966272  ;;  %p2435_p7 = scmp.eq.s32.totalorder %s2057_s22, 0 }
  0x69   : > { %1972 = dma.done.wait (%p2435_p7), [#allocation6], 8192   ;;  %p2436_p8 = pmov %p2435_p7 }
  0x6a   : > { %v2002_v0 = vmov 0   ;;  %v1749_v1 = vld [vmem:[#allocation5 + $0x4] ss:$16 sps:$4 sm:$0xff]   ;;  %v1751_v2 = vld [vmem:[#allocation5 + $0xc] ss:$16 sps:$4 sm:$0xff]   ;;  %s1466_s10 = sshll.u32 %s2214_s17, 7 }
  0x6b   : > { %1974 = vsyncadd (%p2436_p8), [#allocation6], 4294959104  ;;  %585 = vmatprep.mubr.bf16.mxu0 %v2002_v0  ;;  %698 = vmatprep.mubr.bf16.mxu1 %v2002_v0  ;;  %v1753_v3 = vld [vmem:[#allocation5] ss:$16 sps:$4 sm:$0xff]   ;;  %v1754_v4 = vld [vmem:[#allocation5 + $0x8] ss:$16 sps:$4 sm:$0xff]  }
  0x6c   : > { %553 = vmatprep.subr.bf16.mxu0 %v1749_v1  ;;  %666 = vmatprep.subr.bf16.mxu1 %v1751_v2  ;;  %v1755_v5 = vld [vmem:[#allocation5 + $0x24] ss:$16 sps:$4 sm:$0xff]   ;;  %v1757_v6 = vld [vmem:[#allocation5 + $0x2c] ss:$16 sps:$4 sm:$0xff]   ;;  %v1759_v7 = vld [vmem:[#allocation5 + $0x20] ss:$16 sps:$4 sm:$0xff]  }
  0x6d   : > { %554 = vmatpush1.bf16.msra.mxu0 %v1753_v3  ;;  %667 = vmatpush1.bf16.msra.mxu1 %v1754_v4  ;;  %v1760_v8 = vld [vmem:[#allocation5 + $0x28] ss:$16 sps:$4 sm:$0xff]   ;;  %v1761_v9 = vld [vmem:[#allocation5 + $0x44] ss:$16 sps:$4 sm:$0xff]   ;;  %v1763_v10 = vld [vmem:[#allocation5 + $0x4c] ss:$16 sps:$4 sm:$0xff]  }
  0x6e   : > { %555 = vmatprep.subr.bf16.mxu0 %v1755_v5  ;;  %668 = vmatprep.subr.bf16.mxu1 %v1757_v6  ;;  %v1765_v11 = vld [vmem:[#allocation5 + $0x40] ss:$16 sps:$4 sm:$0xff]   ;;  %v1766_v12 = vld [vmem:[#allocation5 + $0x48] ss:$16 sps:$4 sm:$0xff]   ;;  %v1767_v13 = vld [vmem:[#allocation5 + $0x64] ss:$16 sps:$4 sm:$0xff]  }
  0x6f   : > { %v1769_v14 = vld [vmem:[#allocation5 + $0x6c] ss:$16 sps:$4 sm:$0xff]   ;;  %v1771_v15 = vld [vmem:[#allocation5 + $0x60] ss:$16 sps:$4 sm:$0xff]   ;;  %v1772_v16 = vld [vmem:[#allocation5 + $0x68] ss:$16 sps:$4 sm:$0xff]  }
  0x70   : > { %v1773_v17 = vld [vmem:[#allocation5 + $0x84] ss:$16 sps:$4 sm:$0xff]   ;;  %v1775_v18 = vld [vmem:[#allocation5 + $0x8c] ss:$16 sps:$4 sm:$0xff]   ;;  %v1777_v19 = vld [vmem:[#allocation5 + $0x80] ss:$16 sps:$4 sm:$0xff]  }
  0x71   : > { %556 = vmatpush1.bf16.msra.mxu0 %v1759_v7  ;;  %669 = vmatpush1.bf16.msra.mxu1 %v1760_v8  ;;  %v1778_v20 = vld [vmem:[#allocation5 + $0x88] ss:$16 sps:$4 sm:$0xff]   ;;  %v1779_v21 = vld [vmem:[#allocation5 + $0xa4] ss:$16 sps:$4 sm:$0xff]   ;;  %v1781_v22 = vld [vmem:[#allocation5 + $0xac] ss:$16 sps:$4 sm:$0xff]  }
  0x72   : > { %557 = vmatprep.subr.bf16.mxu0 %v1761_v9  ;;  %670 = vmatprep.subr.bf16.mxu1 %v1763_v10  ;;  %v1783_v23 = vld [vmem:[#allocation5 + $0xa0] ss:$16 sps:$4 sm:$0xff]   ;;  %v1784_v24 = vld [vmem:[#allocation5 + $0xa8] ss:$16 sps:$4 sm:$0xff]   ;;  %v1785_v25 = vld [vmem:[#allocation5 + $0xc4] ss:$16 sps:$4 sm:$0xff]   ;;  %v325_v10 = vlaneseq }
  0x73   : > { %v1787_v26 = vld [vmem:[#allocation5 + $0xcc] ss:$16 sps:$4 sm:$0xff]   ;;  %v1789_v27 = vld [vmem:[#allocation5 + $0xc0] ss:$16 sps:$4 sm:$0xff]   ;;  %v1790_v28 = vld [vmem:[#allocation5 + $0xc8] ss:$16 sps:$4 sm:$0xff]  }
  0x74   : > { %v1791_v29 = vld [vmem:[#allocation5 + $0xe4] ss:$16 sps:$4 sm:$0xff]   ;;  %v1793_v30 = vld [vmem:[#allocation5 + $0xec] ss:$16 sps:$4 sm:$0xff]   ;;  %v1795_v31 = vld [vmem:[#allocation5 + $0xe0] ss:$16 sps:$4 sm:$0xff]  }
  0x75   : > { %558 = vmatpush1.bf16.msra.mxu0 %v1765_v11  ;;  %671 = vmatpush1.bf16.msra.mxu1 %v1766_v12  ;;  %v1796_v32 = vld [vmem:[#allocation5 + $0xe8] ss:$16 sps:$4 sm:$0xff]   ;;  %v1797_v33 = vld [vmem:[%s2218_s9] sm:$0xff]   ;;  %v1813_v43 = vld [vmem:[#allocation7 + $0x50] sm:$0xff]   ;;  %v326_v11 = vshrl.u32 %v325_v10, 7  ;;  %s2335_s28 = scalar_lea.vmem [#allocation8], %s1466_s10 }
  0x76   : > { %559 = vmatprep.subr.bf16.mxu0 %v1767_v13  ;;  %672 = vmatprep.subr.bf16.mxu1 %v1769_v14  ;;  %v1805_v34 = vld [vmem:[#allocation7 + $0x40] sm:$0xff]   ;;  %v1809_v38 = vld [vmem:[#allocation7 + $0x48] sm:$0xff]   ;;  %v1814_v44 = vld [vmem:[#allocation7 + $0x10] sm:$0xff]   ;;  %s1546_s14 = sshll.u32 %s2057_s22, 11  ;;  %s1362_s15 = sshll.u32 %s2335_s28, 4  ;;  %s2372_s15 = int_to_ptr.vmem [resolvable:$true] %s1362_s15 }
  0x77   : > { %v1806_v35 = vld [vmem:[#allocation7] sm:$0xff]   ;;  %v1810_v39 = vld [vmem:[#allocation7 + $0x8] sm:$0xff]   ;;  %v1815_v45 = vld [vmem:[#allocation7 + $0xd0] sm:$0xff]   ;;  %v327_v12 = vsub.s32 0, %v326_v11  ;;  %v335_v13 = vsub.s32 2, %v326_v11  ;;  %s2370_s23 = scalar_lea.hbm %s2423_s5, %s1546_s14  ;;  %s1349_s7 = scalar_lea.sflag [#allocation4], %s2214_s17 }
  0x78   : > { %v1807_v36 = vld [vmem:[#allocation7 + $0xc0] sm:$0xff]   ;;  %v1811_v40 = vld [vmem:[#allocation7 + $0xc8] sm:$0xff]   ;;  %v1816_v46 = vld [vmem:[#allocation7 + $0x90] sm:$0xff]   ;;  %s1923_s6 = scalar_lea.vmem %s2372_s15, 2048  ;;  %p2437_p0 = scmp.ne.s32.totalorder %s2432_s29, 0 }
  0x79   : > { %560 = vmatpush1.bf16.msra.mxu0 %v1771_v15  ;;  %673 = vmatpush1.bf16.msra.mxu1 %v1772_v16  ;;  %v1808_v37 = vld [vmem:[#allocation7 + $0x80] sm:$0xff]   ;;  %v1798_v41 = vld [vmem:[%s2218_s9 + $0x8] sm:$0xff]   ;;  %v1817_v47 = vld [vmem:[#allocation7 + $0x58] sm:$0xff]   ;;  %v339_v15 = vsub.s32 3, %v326_v11  ;;  %p1924_p11 = scmp.ne.s32.totalorder %s2372_s15, %s1923_s6  ;;  %s2003_s22 = smov [#allocation8]  }
  0x7a   : > { %561 = vmatprep.subr.bf16.mxu0 %v1773_v17  ;;  %674 = vmatprep.subr.bf16.mxu1 %v1775_v18  ;;  %v1812_v42 = vld [vmem:[#allocation7 + $0x88] sm:$0xff]   ;;  %v1818_v48 = vld [vmem:[#allocation7 + $0x18] sm:$0xff]   ;;  %v1799_v50 = vld [vmem:[%s2218_s9 + $0x10] sm:$0xff]   ;;  %s1927_s8 = sshll.u32 %s2003_s22, 4  ;;  %s1928_s8 = int_to_ptr.vmem [resolvable:$false] %s1927_s8 }
  0x7b   : > { %v1819_v49 = vld [vmem:[#allocation7 + $0xd8] sm:$0xff]   ;;  %v1821_v52 = vld [vmem:[#allocation7 + $0x60] sm:$0xff]   ;;  %v1825_v56 = vld [vmem:[#allocation7 + $0x68] sm:$0xff]   ;;  %p1925_p1 = pnand %p1924_p11, %p2437_p0  ;;  %p1930_p5 = scmp.lt.s32.totalorder %s2372_s15, %s1928_s8 }
  0x7c   : > { %v1820_v51 = vld [vmem:[#allocation7 + $0x98] sm:$0xff]   ;;  %v1822_v53 = vld [vmem:[#allocation7 + $0x20] sm:$0xff]   ;;  %v1826_v57 = vld [vmem:[#allocation7 + $0x28] sm:$0xff]  }
  0x7d   : > { %562 = vmatpush1.bf16.msra.mxu0 %v1777_v19  ;;  %675 = vmatpush1.bf16.msra.mxu1 %v1778_v20  ;;  %v1823_v54 = vld [vmem:[#allocation7 + $0xe0] sm:$0xff]   ;;  %v1827_v58 = vld [vmem:[#allocation7 + $0xe8] sm:$0xff]   ;;  %v1829_v60 = vld [vmem:[#allocation7 + $0x70] sm:$0xff]   ;;  %p1926_p3 = pneg %p1925_p1 }
  0x7e   : > { %563 = vmatprep.subr.bf16.mxu0 %v1779_v21  ;;  %676 = vmatprep.subr.bf16.mxu1 %v1781_v22  ;;  %v1824_v55 = vld [vmem:[#allocation7 + $0xa0] sm:$0xff]   ;;  %v1828_v59 = vld [vmem:[#allocation7 + $0xa8] sm:$0xff]   ;;  %v1800_v61 = vld [vmem:[%s2218_s9 + $0x18] sm:$0xff]  }
  0x7f   : > { %v1831_v62 = vld [vmem:[#allocation7 + $0xf0] sm:$0xff]   ;;  %v1801_v2 = vld [vmem:[%s2218_s9 + $0x20] sm:$0xff]   ;;  %v1802_v3 = vld [vmem:[%s2218_s9 + $0x28] sm:$0xff]  }
  0x80   : > { %v1830_v63 = vld [vmem:[#allocation7 + $0x30] sm:$0xff]   ;;  %v1804_v5 = vld [vmem:[%s2218_s9 + $0x38] sm:$0xff]   ;;  %v323_v14 = vld [vmem:[%s2420_s2] sm:$0xf] }
  0x81   : > { %564 = vmatpush1.bf16.msra.mxu0 %v1783_v23  ;;  %677 = vmatpush1.bf16.msra.mxu1 %v1784_v24  ;;  %v1832_v1 = vld [vmem:[#allocation7 + $0xb0] sm:$0xff]   ;;  %v1833_v6 = vld [vmem:[#allocation7 + $0x78] sm:$0xff]   ;;  %v2255_v16 = vrot.slane %v323_v14, %v327_v12  ;;  %v2257_v17 = vrot.slane %v323_v14, %v335_v13  ;;  %v2261_v19 = vrot.slane %v323_v14, %v339_v15 }
  0x82   : > { %565 = vmatprep.subr.bf16.mxu0 %v1785_v25  ;;  %678 = vmatprep.subr.bf16.mxu1 %v1787_v26  ;;  %v1803_v4 = vld [vmem:[%s2218_s9 + $0x30] sm:$0xff]   ;;  %v1835_v7 = vld [vmem:[#allocation7 + $0xf8] sm:$0xff]   ;;  %s1929_s9 = scalar_lea.vmem %s1928_s8, 4096 }
  0x83   : > { %v1834_v8 = vld [vmem:[#allocation7 + $0x38] sm:$0xff]   ;;  %p1931_p9 = scmp.lt.s32.totalorder %s1929_s9, %s1923_s6 }
  0x84   : > { %v1836_v9 = vld [vmem:[#allocation7 + $0xb8] sm:$0xff]  }
  0x85   : > { %566 = vmatpush1.bf16.msra.mxu0 %v1789_v27  ;;  %679 = vmatpush1.bf16.msra.mxu1 %v1790_v28  ;;  %p1932_p12 = por %p1931_p9, %p1930_p5 }
  0x86   : > { %567 = vmatprep.subr.bf16.mxu0 %v1791_v29  ;;  %680 = vmatprep.subr.bf16.mxu1 %v1793_v30 }
  0x87   : > { %p1933_p2 = pnand %p1932_p12, %p1926_p3 }
  0x89   : > { %568 = vmatpush1.bf16.msra.mxu0 %v1795_v31  ;;  %681 = vmatpush1.bf16.msra.mxu1 %v1796_v32 }
  0x8a   : > { %1547 = vmatprep.subr.bf16.mxu0 %v1805_v34  ;;  %1611 = vmatprep.subr.bf16.mxu1 %v1807_v36 }
  0x8c   : > { %586 = vmatmul.mubr.bf16.vlgmr.msra.gmra.mrb[0].mxu0 %v1797_v33  ;;  %699 = vmatmul.mubr.bf16.vlgmr.msra.gmra.mrb[0].mxu1 %v1797_v33 }
  0x8d   : > { %595 = vmatprep.mubr.bf16.mxu0 %v2002_v0  ;;  %708 = vmatprep.mubr.bf16.mxu1 %v2002_v0 }
  0x8e   : > { %1548 = vmatpush3.bf16.msra.mxu0 %v1806_v35  ;;  %1612 = vmatpush3.bf16.msra.mxu1 %v1808_v37 }
  0x8f   : > { %1549 = vmatprep.subr.bf16.mxu0 %v1809_v38  ;;  %1613 = vmatprep.subr.bf16.mxu1 %v1811_v40 }
  0x92   : > { %1550 = vmatpush3.bf16.msra.mxu0 %v1810_v39  ;;  %1614 = vmatpush3.bf16.msra.mxu1 %v1812_v42 }
  0x93   : > { %1551 = vmatprep.subr.bf16.mxu0 %v1813_v43  ;;  %1615 = vmatprep.subr.bf16.mxu1 %v1815_v45 }
  0x94   : > { %596 = vmatmul.mubr.bf16.gmra.mrb[4].mxu0 %v1798_v41  ;;  %709 = vmatmul.mubr.bf16.gmra.mrb[4].mxu1 %v1798_v41 }
  0x95   : > { %605 = vmatprep.mubr.bf16.mxu0 %v2002_v0  ;;  %718 = vmatprep.mubr.bf16.mxu1 %v2002_v0 }
  0x96   : > { %1552 = vmatpush3.bf16.msra.mxu0 %v1814_v44  ;;  %1616 = vmatpush3.bf16.msra.mxu1 %v1816_v46 }
  0x97   : > { %1553 = vmatprep.subr.bf16.mxu0 %v1817_v47  ;;  %1617 = vmatprep.subr.bf16.mxu1 %v1819_v49 }
  0x9a   : > { %1554 = vmatpush3.bf16.msra.mxu0 %v1818_v48  ;;  %1618 = vmatpush3.bf16.msra.mxu1 %v1820_v51 }
  0x9b   : > { %1555 = vmatprep.subr.bf16.mxu0 %v1821_v52  ;;  %1619 = vmatprep.subr.bf16.mxu1 %v1823_v54 }
  0x9c   : > { %606 = vmatmul.mubr.bf16.gmra.mrb[8].mxu0 %v1799_v50  ;;  %719 = vmatmul.mubr.bf16.gmra.mrb[8].mxu1 %v1799_v50 }
  0x9d   : > { %615 = vmatprep.mubr.bf16.mxu0 %v2002_v0  ;;  %728 = vmatprep.mubr.bf16.mxu1 %v2002_v0 }
  0x9e   : > { %1556 = vmatpush3.bf16.msra.mxu0 %v1822_v53  ;;  %1620 = vmatpush3.bf16.msra.mxu1 %v1824_v55 }
  0x9f   : > { %1557 = vmatprep.subr.bf16.mxu0 %v1825_v56  ;;  %1621 = vmatprep.subr.bf16.mxu1 %v1827_v58 }
  0xa2   : > { %1558 = vmatpush3.bf16.msra.mxu0 %v1826_v57  ;;  %1622 = vmatpush3.bf16.msra.mxu1 %v1828_v59 }
  0xa3   : > { %1559 = vmatprep.subr.bf16.mxu0 %v1829_v60  ;;  %1623 = vmatprep.subr.bf16.mxu1 %v1831_v62 }
  0xa4   : > { %616 = vmatmul.mubr.bf16.gmra.mrb[12].mxu0 %v1800_v61  ;;  %729 = vmatmul.mubr.bf16.gmra.mrb[12].mxu1 %v1800_v61 }
  0xa5   : > { %625 = vmatprep.mubr.bf16.mxu0 %v2002_v0  ;;  %738 = vmatprep.mubr.bf16.mxu1 %v2002_v0 }
  0xa6   : > { %1560 = vmatpush3.bf16.msra.mxu0 %v1830_v63  ;;  %1624 = vmatpush3.bf16.msra.mxu1 %v1832_v1 }
  0xa7   : > { %1561 = vmatprep.subr.bf16.mxu0 %v1833_v6  ;;  %1625 = vmatprep.subr.bf16.mxu1 %v1835_v7 }
  0xaa   : > { %1562 = vmatpush3.bf16.msra.mxu0 %v1834_v8  ;;  %1626 = vmatpush3.bf16.msra.mxu1 %v1836_v9 }
  0xac   : > { %626 = vmatmul.mubr.bf16.gmra.mrb[16].mxu0 %v1801_v2  ;;  %739 = vmatmul.mubr.bf16.gmra.mrb[16].mxu1 %v1801_v2 }
  0xad   : > { %635 = vmatprep.mubr.bf16.mxu0 %v2002_v0  ;;  %748 = vmatprep.mubr.bf16.mxu1 %v2002_v0 }
  0xb4   : > { %636 = vmatmul.mubr.bf16.gmra.mrb[20].mxu0 %v1802_v3  ;;  %749 = vmatmul.mubr.bf16.gmra.mrb[20].mxu1 %v1802_v3 }
  0xb5   : > { %645 = vmatprep.mubr.bf16.mxu0 %v2002_v0  ;;  %758 = vmatprep.mubr.bf16.mxu1 %v2002_v0 }
  0xbc   : > { %646 = vmatmul.mubr.bf16.gmra.mrb[24].mxu0 %v1803_v4  ;;  %759 = vmatmul.mubr.bf16.gmra.mrb[24].mxu1 %v1803_v4 }
  0xbd   : > { %655 = vmatprep.mubr.bf16.mxu0 %v2002_v0  ;;  %768 = vmatprep.mubr.bf16.mxu1 %v2002_v0  ;;  %v331_v0 = vsub.s32 1, %v326_v11 }
  0xbf   : > { %v2259_v18 = vrot.slane %v323_v14, %v331_v0 }
  0xc4   : > { %656 = vmatmul.mubr.bf16.gmra.mrb[28].mxu0 %v1804_v5  ;;  %769 = vmatmul.mubr.bf16.gmra.mrb[28].mxu1 %v1804_v5 }
 0x15f   : > { %v587_v20 = vpop.f32.mrb[0].mxu0  ;;  %v700_v21 = vpop.f32.mrb[0].mxu1 }
 0x160   : > { %v588_v22 = vadd.f32 %v587_v20, %v2255_v16  ;;  %v701_v23 = vadd.f32 %v700_v21, %v2257_v17  ;;  %v589_v24 = vpop.f32.mrb[1].mxu0  ;;  %v702_v25 = vpop.f32.mrb[1].mxu1 }
 0x161   : > { %v590_v26 = vadd.f32 %v589_v24, %v2259_v18  ;;  %v703_v27 = vadd.f32 %v702_v25, %v2261_v19  ;;  %v591_v28 = vpop.f32.mrb[2].mxu0  ;;  %v704_v29 = vpop.f32.mrb[2].mxu1 }
 0x162   : > { %v781_v30 = vmax.f32 %v701_v23, 0.0  ;;  %v592_v31 = vadd.f32 %v591_v28, %v2255_v16  ;;  %v705_v32 = vadd.f32 %v704_v29, %v2257_v17  ;;  %v593_v33 = vpop.f32.mrb[3].mxu0  ;;  %v706_v34 = vpop.f32.mrb[3].mxu1  ;;  %v779_v38 = vmax.f32 %v588_v22, 0.0 }
 0x163   : > { %v782_v35 = vmax.f32 %v703_v27, 0.0  ;;  %v594_v36 = vadd.f32 %v593_v33, %v2259_v18  ;;  %v707_v37 = vadd.f32 %v706_v34, %v2261_v19  ;;  %v780_v41 = vmax.f32 %v590_v26, 0.0 }
 0x164   : > { %v783_v39 = vmax.f32 %v592_v31, 0.0  ;;  %v785_v40 = vmax.f32 %v705_v32, 0.0 }
 0x165   : > { %v784_v42 = vmax.f32 %v594_v36, 0.0  ;;  %v786_v43 = vmax.f32 %v707_v37, 0.0 }
 0x166   : > { %v843_v44 = vpack.c.bf16 %v783_v39, %v779_v38  ;;  %v845_v45 = vpack.c.bf16 %v785_v40, %v781_v30 }
 0x167   : > { %v844_v46 = vpack.c.bf16 %v784_v42, %v780_v41  ;;  %v846_v47 = vpack.c.bf16 %v786_v43, %v782_v35  ;;  %v597_v48 = vpop.f32.mrb[4].mxu0  ;;  %v710_v49 = vpop.f32.mrb[4].mxu1 }
 0x168   : > { %v598_v50 = vadd.f32 %v597_v48, %v2255_v16  ;;  %v711_v51 = vadd.f32 %v710_v49, %v2257_v17  ;;  %v599_v52 = vpop.f32.mrb[5].mxu0  ;;  %v712_v53 = vpop.f32.mrb[5].mxu1 }
 0x169   : > { %v600_v54 = vadd.f32 %v599_v52, %v2259_v18  ;;  %v713_v55 = vadd.f32 %v712_v53, %v2261_v19  ;;  %v601_v56 = vpop.f32.mrb[6].mxu0  ;;  %v714_v57 = vpop.f32.mrb[6].mxu1  ;;  %1170 = vmatprep.mubr.bf16.mxu0 %v844_v46  ;;  %1267 = vmatprep.mubr.bf16.mxu1 %v846_v47 }
 0x16a   : > { %v789_v58 = vmax.f32 %v711_v51, 0.0  ;;  %v602_v59 = vadd.f32 %v601_v56, %v2255_v16  ;;  %v715_v60 = vadd.f32 %v714_v57, %v2257_v17  ;;  %v603_v61 = vpop.f32.mrb[7].mxu0  ;;  %v716_v62 = vpop.f32.mrb[7].mxu1  ;;  %1171 = vmatmul.mubr.bf16.vlgmr.msra.gmra.mrb[32].mxu0 %v843_v44  ;;  %1268 = vmatmul.mubr.bf16.vlgmr.msra.gmra.mrb[32].mxu1 %v845_v45  ;;  %v787_v3 = vmax.f32 %v598_v50, 0.0 }
 0x16b   : > { %v790_v63 = vmax.f32 %v713_v55, 0.0  ;;  %v604_v1 = vadd.f32 %v603_v61, %v2259_v18  ;;  %v717_v2 = vadd.f32 %v716_v62, %v2261_v19  ;;  %v788_v6 = vmax.f32 %v600_v54, 0.0 }
 0x16c   : > { %v791_v4 = vmax.f32 %v602_v59, 0.0  ;;  %v793_v5 = vmax.f32 %v715_v60, 0.0 }
 0x16d   : > { %v792_v7 = vmax.f32 %v604_v1, 0.0  ;;  %v794_v8 = vmax.f32 %v717_v2, 0.0 }
 0x16e   : > { %v847_v9 = vpack.c.bf16 %v791_v4, %v787_v3  ;;  %v849_v10 = vpack.c.bf16 %v793_v5, %v789_v58 }
 0x16f   : > { %v848_v11 = vpack.c.bf16 %v792_v7, %v788_v6  ;;  %v850_v12 = vpack.c.bf16 %v794_v8, %v790_v63  ;;  %v607_v13 = vpop.f32.mrb[8].mxu0  ;;  %v720_v14 = vpop.f32.mrb[8].mxu1 }
 0x170   : > { %v608_v0 = vadd.f32 %v607_v13, %v2255_v16  ;;  %v721_v15 = vadd.f32 %v720_v14, %v2257_v17  ;;  %v609_v20 = vpop.f32.mrb[9].mxu0  ;;  %v722_v21 = vpop.f32.mrb[9].mxu1 }
 0x171   : > { %v610_v22 = vadd.f32 %v609_v20, %v2259_v18  ;;  %v723_v23 = vadd.f32 %v722_v21, %v2261_v19  ;;  %v611_v24 = vpop.f32.mrb[10].mxu0  ;;  %v724_v25 = vpop.f32.mrb[10].mxu1  ;;  %1178 = vmatprep.mubr.bf16.mxu0 %v848_v11  ;;  %1275 = vmatprep.mubr.bf16.mxu1 %v850_v12 }
 0x172   : > { %v797_v26 = vmax.f32 %v721_v15, 0.0  ;;  %v612_v27 = vadd.f32 %v611_v24, %v2255_v16  ;;  %v725_v28 = vadd.f32 %v724_v25, %v2257_v17  ;;  %v613_v29 = vpop.f32.mrb[11].mxu0  ;;  %v726_v30 = vpop.f32.mrb[11].mxu1  ;;  %1179 = vmatmul.mubr.bf16.gmra.mrb[36].mxu0 %v847_v9  ;;  %1276 = vmatmul.mubr.bf16.gmra.mrb[36].mxu1 %v849_v10  ;;  %v795_v34 = vmax.f32 %v608_v0, 0.0 }
 0x173   : > { %v798_v31 = vmax.f32 %v723_v23, 0.0  ;;  %v614_v32 = vadd.f32 %v613_v29, %v2259_v18  ;;  %v727_v33 = vadd.f32 %v726_v30, %v2261_v19  ;;  %v796_v37 = vmax.f32 %v610_v22, 0.0 }
 0x174   : > { %v799_v35 = vmax.f32 %v612_v27, 0.0  ;;  %v801_v36 = vmax.f32 %v725_v28, 0.0 }
 0x175   : > { %v800_v38 = vmax.f32 %v614_v32, 0.0  ;;  %v802_v39 = vmax.f32 %v727_v33, 0.0 }
 0x176   : > { %v851_v40 = vpack.c.bf16 %v799_v35, %v795_v34  ;;  %v853_v41 = vpack.c.bf16 %v801_v36, %v797_v26 }
 0x177   : > { %v852_v42 = vpack.c.bf16 %v800_v38, %v796_v37  ;;  %v854_v43 = vpack.c.bf16 %v802_v39, %v798_v31  ;;  %v617_v44 = vpop.f32.mrb[12].mxu0  ;;  %v730_v45 = vpop.f32.mrb[12].mxu1 }
 0x178   : > { %v618_v46 = vadd.f32 %v617_v44, %v2255_v16  ;;  %v731_v47 = vadd.f32 %v730_v45, %v2257_v17  ;;  %v619_v48 = vpop.f32.mrb[13].mxu0  ;;  %v732_v49 = vpop.f32.mrb[13].mxu1 }
 0x179   : > { %v620_v50 = vadd.f32 %v619_v48, %v2259_v18  ;;  %v733_v51 = vadd.f32 %v732_v49, %v2261_v19  ;;  %v621_v52 = vpop.f32.mrb[14].mxu0  ;;  %v734_v53 = vpop.f32.mrb[14].mxu1  ;;  %1186 = vmatprep.mubr.bf16.mxu0 %v852_v42  ;;  %1283 = vmatprep.mubr.bf16.mxu1 %v854_v43 }
 0x17a   : > { %v805_v54 = vmax.f32 %v731_v47, 0.0  ;;  %v622_v55 = vadd.f32 %v621_v52, %v2255_v16  ;;  %v735_v56 = vadd.f32 %v734_v53, %v2257_v17  ;;  %v623_v57 = vpop.f32.mrb[15].mxu0  ;;  %v736_v58 = vpop.f32.mrb[15].mxu1  ;;  %1187 = vmatmul.mubr.bf16.gmra.mrb[40].mxu0 %v851_v40  ;;  %1284 = vmatmul.mubr.bf16.gmra.mrb[40].mxu1 %v853_v41  ;;  %v803_v62 = vmax.f32 %v618_v46, 0.0 }
 0x17b   : > { %v806_v59 = vmax.f32 %v733_v51, 0.0  ;;  %v624_v60 = vadd.f32 %v623_v57, %v2259_v18  ;;  %v737_v61 = vadd.f32 %v736_v58, %v2261_v19  ;;  %v804_v2 = vmax.f32 %v620_v50, 0.0 }
 0x17c   : > { %v807_v63 = vmax.f32 %v622_v55, 0.0  ;;  %v809_v1 = vmax.f32 %v735_v56, 0.0 }
 0x17d   : > { %v808_v3 = vmax.f32 %v624_v60, 0.0  ;;  %v810_v4 = vmax.f32 %v737_v61, 0.0 }
 0x17e   : > { %v855_v5 = vpack.c.bf16 %v807_v63, %v803_v62  ;;  %v857_v6 = vpack.c.bf16 %v809_v1, %v805_v54 }
 0x17f   : > { %v856_v7 = vpack.c.bf16 %v808_v3, %v804_v2  ;;  %v858_v8 = vpack.c.bf16 %v810_v4, %v806_v59  ;;  %v627_v9 = vpop.f32.mrb[16].mxu0  ;;  %v740_v10 = vpop.f32.mrb[16].mxu1 }
 0x180   : > { %v628_v11 = vadd.f32 %v627_v9, %v2255_v16  ;;  %v741_v12 = vadd.f32 %v740_v10, %v2257_v17  ;;  %v629_v13 = vpop.f32.mrb[17].mxu0  ;;  %v742_v14 = vpop.f32.mrb[17].mxu1 }
 0x181   : > { %v630_v0 = vadd.f32 %v629_v13, %v2259_v18  ;;  %v743_v15 = vadd.f32 %v742_v14, %v2261_v19  ;;  %v631_v20 = vpop.f32.mrb[18].mxu0  ;;  %v744_v21 = vpop.f32.mrb[18].mxu1  ;;  %1194 = vmatprep.mubr.bf16.mxu0 %v856_v7  ;;  %1291 = vmatprep.mubr.bf16.mxu1 %v858_v8 }
 0x182   : > { %v813_v22 = vmax.f32 %v741_v12, 0.0  ;;  %v632_v23 = vadd.f32 %v631_v20, %v2255_v16  ;;  %v745_v24 = vadd.f32 %v744_v21, %v2257_v17  ;;  %v633_v25 = vpop.f32.mrb[19].mxu0  ;;  %v746_v26 = vpop.f32.mrb[19].mxu1  ;;  %1195 = vmatmul.mubr.bf16.gmra.mrb[44].mxu0 %v855_v5  ;;  %1292 = vmatmul.mubr.bf16.gmra.mrb[44].mxu1 %v857_v6  ;;  %v811_v30 = vmax.f32 %v628_v11, 0.0 }
 0x183   : > { %v814_v27 = vmax.f32 %v743_v15, 0.0  ;;  %v634_v28 = vadd.f32 %v633_v25, %v2259_v18  ;;  %v747_v29 = vadd.f32 %v746_v26, %v2261_v19  ;;  %v812_v33 = vmax.f32 %v630_v0, 0.0 }
 0x184   : > { %v815_v31 = vmax.f32 %v632_v23, 0.0  ;;  %v817_v32 = vmax.f32 %v745_v24, 0.0 }
 0x185   : > { %v816_v34 = vmax.f32 %v634_v28, 0.0  ;;  %v818_v35 = vmax.f32 %v747_v29, 0.0 }
 0x186   : > { %v859_v36 = vpack.c.bf16 %v815_v31, %v811_v30  ;;  %v861_v37 = vpack.c.bf16 %v817_v32, %v813_v22 }
 0x187   : > { %v860_v38 = vpack.c.bf16 %v816_v34, %v812_v33  ;;  %v862_v39 = vpack.c.bf16 %v818_v35, %v814_v27  ;;  %v637_v40 = vpop.f32.mrb[20].mxu0  ;;  %v750_v41 = vpop.f32.mrb[20].mxu1 }
 0x188   : > { %v638_v42 = vadd.f32 %v637_v40, %v2255_v16  ;;  %v751_v43 = vadd.f32 %v750_v41, %v2257_v17  ;;  %v639_v44 = vpop.f32.mrb[21].mxu0  ;;  %v752_v45 = vpop.f32.mrb[21].mxu1 }
 0x189   : > { %v640_v46 = vadd.f32 %v639_v44, %v2259_v18  ;;  %v753_v47 = vadd.f32 %v752_v45, %v2261_v19  ;;  %v641_v48 = vpop.f32.mrb[22].mxu0  ;;  %v754_v49 = vpop.f32.mrb[22].mxu1  ;;  %1202 = vmatprep.mubr.bf16.mxu0 %v860_v38  ;;  %1299 = vmatprep.mubr.bf16.mxu1 %v862_v39 }
 0x18a   : > { %v821_v50 = vmax.f32 %v751_v43, 0.0  ;;  %v642_v51 = vadd.f32 %v641_v48, %v2255_v16  ;;  %v755_v52 = vadd.f32 %v754_v49, %v2257_v17  ;;  %v643_v53 = vpop.f32.mrb[23].mxu0  ;;  %v756_v54 = vpop.f32.mrb[23].mxu1  ;;  %1203 = vmatmul.mubr.bf16.gmra.mrb[48].mxu0 %v859_v36  ;;  %1300 = vmatmul.mubr.bf16.gmra.mrb[48].mxu1 %v861_v37  ;;  %v819_v58 = vmax.f32 %v638_v42, 0.0 }
 0x18b   : > { %v822_v55 = vmax.f32 %v753_v47, 0.0  ;;  %v644_v56 = vadd.f32 %v643_v53, %v2259_v18  ;;  %v757_v57 = vadd.f32 %v756_v54, %v2261_v19  ;;  %v820_v61 = vmax.f32 %v640_v46, 0.0 }
 0x18c   : > { %v823_v59 = vmax.f32 %v642_v51, 0.0  ;;  %v825_v60 = vmax.f32 %v755_v52, 0.0 }
 0x18d   : > { %v824_v62 = vmax.f32 %v644_v56, 0.0  ;;  %v826_v63 = vmax.f32 %v757_v57, 0.0 }
 0x18e   : > { %v863_v1 = vpack.c.bf16 %v823_v59, %v819_v58  ;;  %v865_v2 = vpack.c.bf16 %v825_v60, %v821_v50 }
 0x18f   : > { %v864_v3 = vpack.c.bf16 %v824_v62, %v820_v61  ;;  %v866_v4 = vpack.c.bf16 %v826_v63, %v822_v55  ;;  %v647_v5 = vpop.f32.mrb[24].mxu0  ;;  %v760_v6 = vpop.f32.mrb[24].mxu1 }
 0x190   : > { %v648_v7 = vadd.f32 %v647_v5, %v2255_v16  ;;  %v761_v8 = vadd.f32 %v760_v6, %v2257_v17  ;;  %v649_v9 = vpop.f32.mrb[25].mxu0  ;;  %v762_v10 = vpop.f32.mrb[25].mxu1 }
 0x191   : > { %v650_v11 = vadd.f32 %v649_v9, %v2259_v18  ;;  %v763_v12 = vadd.f32 %v762_v10, %v2261_v19  ;;  %v651_v13 = vpop.f32.mrb[26].mxu0  ;;  %v764_v14 = vpop.f32.mrb[26].mxu1  ;;  %1210 = vmatprep.mubr.bf16.mxu0 %v864_v3  ;;  %1307 = vmatprep.mubr.bf16.mxu1 %v866_v4 }
 0x192   : > { %v829_v0 = vmax.f32 %v761_v8, 0.0  ;;  %v652_v15 = vadd.f32 %v651_v13, %v2255_v16  ;;  %v765_v20 = vadd.f32 %v764_v14, %v2257_v17  ;;  %v653_v21 = vpop.f32.mrb[27].mxu0  ;;  %v766_v22 = vpop.f32.mrb[27].mxu1  ;;  %1211 = vmatmul.mubr.bf16.gmra.mrb[52].mxu0 %v863_v1  ;;  %1308 = vmatmul.mubr.bf16.gmra.mrb[52].mxu1 %v865_v2  ;;  %v827_v26 = vmax.f32 %v648_v7, 0.0 }
 0x193   : > { %v830_v23 = vmax.f32 %v763_v12, 0.0  ;;  %v654_v24 = vadd.f32 %v653_v21, %v2259_v18  ;;  %v767_v25 = vadd.f32 %v766_v22, %v2261_v19  ;;  %v828_v29 = vmax.f32 %v650_v11, 0.0 }
 0x194   : > { %v831_v27 = vmax.f32 %v652_v15, 0.0  ;;  %v833_v28 = vmax.f32 %v765_v20, 0.0 }
 0x195   : > { %v832_v30 = vmax.f32 %v654_v24, 0.0  ;;  %v834_v31 = vmax.f32 %v767_v25, 0.0 }
 0x196   : > { %v867_v32 = vpack.c.bf16 %v831_v27, %v827_v26  ;;  %v869_v33 = vpack.c.bf16 %v833_v28, %v829_v0 }
 0x197   : > { %v868_v34 = vpack.c.bf16 %v832_v30, %v828_v29  ;;  %v870_v35 = vpack.c.bf16 %v834_v31, %v830_v23  ;;  %v657_v36 = vpop.f32.mrb[28].mxu0  ;;  %v770_v37 = vpop.f32.mrb[28].mxu1 }
 0x198   : > { %v658_v38 = vadd.f32 %v657_v36, %v2255_v16  ;;  %v771_v39 = vadd.f32 %v770_v37, %v2257_v17  ;;  %v659_v40 = vpop.f32.mrb[29].mxu0  ;;  %v772_v41 = vpop.f32.mrb[29].mxu1 }
 0x199   : > { %v660_v42 = vadd.f32 %v659_v40, %v2259_v18  ;;  %v773_v43 = vadd.f32 %v772_v41, %v2261_v19  ;;  %v661_v44 = vpop.f32.mrb[30].mxu0  ;;  %v774_v45 = vpop.f32.mrb[30].mxu1  ;;  %1218 = vmatprep.mubr.bf16.mxu0 %v868_v34  ;;  %1315 = vmatprep.mubr.bf16.mxu1 %v870_v35 }
 0x19a   : > { %v837_v46 = vmax.f32 %v771_v39, 0.0  ;;  %v662_v47 = vadd.f32 %v661_v44, %v2255_v16  ;;  %v775_v48 = vadd.f32 %v774_v45, %v2257_v17  ;;  %v663_v49 = vpop.f32.mrb[31].mxu0  ;;  %v776_v50 = vpop.f32.mrb[31].mxu1  ;;  %1219 = vmatmul.mubr.bf16.gmra.mrb[56].mxu0 %v867_v32  ;;  %1316 = vmatmul.mubr.bf16.gmra.mrb[56].mxu1 %v869_v33  ;;  %v835_v54 = vmax.f32 %v658_v38, 0.0 }
 0x19b   : > { %v838_v51 = vmax.f32 %v773_v43, 0.0  ;;  %v664_v52 = vadd.f32 %v663_v49, %v2259_v18  ;;  %v777_v53 = vadd.f32 %v776_v50, %v2261_v19  ;;  %v836_v57 = vmax.f32 %v660_v42, 0.0  ;;  %v2330_v18 = vld [vmem:[%s2422_s4] ss:$0 sm:$0xff] }
 0x19c   : > { %v839_v55 = vmax.f32 %v662_v47, 0.0  ;;  %v841_v56 = vmax.f32 %v775_v48, 0.0 }
 0x19d   : > { %v840_v58 = vmax.f32 %v664_v52, 0.0  ;;  %v842_v59 = vmax.f32 %v777_v53, 0.0 }
 0x19e   : > { %v871_v60 = vpack.c.bf16 %v839_v55, %v835_v54  ;;  %v873_v16 = vpack.c.bf16 %v841_v56, %v837_v46 }
 0x19f   : > { %v872_v61 = vpack.c.bf16 %v840_v58, %v836_v57  ;;  %v874_v17 = vpack.c.bf16 %v842_v59, %v838_v51 }
 0x1a1   : > { %1226 = vmatprep.mubr.bf16.mxu0 %v872_v61  ;;  %1323 = vmatprep.mubr.bf16.mxu1 %v874_v17 }
 0x1a2   : > { %1227 = vmatmul.mubr.bf16.gmra.mrb[60].mxu0 %v871_v60  ;;  %1324 = vmatmul.mubr.bf16.gmra.mrb[60].mxu1 %v873_v16 }
 0x23d   : > { %v1563_v62 = vpop.f32.mrb[32].mxu0  ;;  %v1627_v63 = vpop.f32.mrb[32].mxu1 }
 0x23e   : > { %v1564_v19 = vpop.f32.mrb[33].mxu0  ;;  %v1628_v1 = vpop.f32.mrb[33].mxu1 }
 0x23f   : > { %v1565_v2 = vadd.f32 %v1564_v19, %v1563_v62  ;;  %v1629_v3 = vadd.f32 %v1628_v1, %v1627_v63  ;;  %v1566_v4 = vpop.f32.mrb[34].mxu0  ;;  %v1630_v5 = vpop.f32.mrb[34].mxu1 }
 0x240   : > { %v1567_v6 = vpop.f32.mrb[35].mxu0  ;;  %v1631_v7 = vpop.f32.mrb[35].mxu1 }
 0x241   : > { %v1173_v8 = vadd.f32 %v1565_v2, %v2330_v18  ;;  %v1568_v9 = vadd.f32 %v1567_v6, %v1566_v4  ;;  %v1632_v10 = vadd.f32 %v1631_v7, %v1630_v5 }
 0x243   : > { %v1270_v11 = vadd.f32 %v1629_v3, %v1173_v8  ;;  %v1176_v12 = vadd.f32 %v1568_v9, %v2330_v18 }
 0x245   : > { %1332 = vst [vmem:[%s2335_s28] sm:$0xff] %v1270_v11  ;;  %v1273_v13 = vadd.f32 %v1632_v10, %v1176_v12  ;;  %v1569_v14 = vpop.f32.mrb[36].mxu0  ;;  %v1633_v0 = vpop.f32.mrb[36].mxu1 }
 0x246   : > { %v1570_v15 = vpop.f32.mrb[37].mxu0  ;;  %v1634_v20 = vpop.f32.mrb[37].mxu1 }
 0x247   : > { %1333 = vst [vmem:[%s2335_s28 + $0x8] sm:$0xff] %v1273_v13  ;;  %v1571_v21 = vadd.f32 %v1570_v15, %v1569_v14  ;;  %v1635_v22 = vadd.f32 %v1634_v20, %v1633_v0  ;;  %v1572_v23 = vpop.f32.mrb[38].mxu0  ;;  %v1636_v24 = vpop.f32.mrb[38].mxu1 }
 0x248   : > { %v1573_v25 = vpop.f32.mrb[39].mxu0  ;;  %v1637_v26 = vpop.f32.mrb[39].mxu1 }
 0x249   : > { %v1181_v27 = vadd.f32 %v1571_v21, %v2330_v18  ;;  %v1574_v28 = vadd.f32 %v1573_v25, %v1572_v23  ;;  %v1638_v29 = vadd.f32 %v1637_v26, %v1636_v24 }
 0x24b   : > { %v1278_v30 = vadd.f32 %v1635_v22, %v1181_v27  ;;  %v1184_v31 = vadd.f32 %v1574_v28, %v2330_v18 }
 0x24d   : > { %1334 = vst [vmem:[%s2335_s28 + $0x10] sm:$0xff] %v1278_v30  ;;  %v1281_v32 = vadd.f32 %v1638_v29, %v1184_v31  ;;  %v1575_v33 = vpop.f32.mrb[40].mxu0  ;;  %v1639_v34 = vpop.f32.mrb[40].mxu1 }
 0x24e   : > { %v1576_v35 = vpop.f32.mrb[41].mxu0  ;;  %v1640_v36 = vpop.f32.mrb[41].mxu1 }
 0x24f   : > { %1335 = vst [vmem:[%s2335_s28 + $0x18] sm:$0xff] %v1281_v32  ;;  %v1577_v37 = vadd.f32 %v1576_v35, %v1575_v33  ;;  %v1641_v38 = vadd.f32 %v1640_v36, %v1639_v34  ;;  %v1578_v39 = vpop.f32.mrb[42].mxu0  ;;  %v1642_v40 = vpop.f32.mrb[42].mxu1 }
 0x250   : > { %v1579_v41 = vpop.f32.mrb[43].mxu0  ;;  %v1643_v42 = vpop.f32.mrb[43].mxu1 }
 0x251   : > { %v1189_v43 = vadd.f32 %v1577_v37, %v2330_v18  ;;  %v1580_v44 = vadd.f32 %v1579_v41, %v1578_v39  ;;  %v1644_v45 = vadd.f32 %v1643_v42, %v1642_v40 }
 0x253   : > { %v1286_v46 = vadd.f32 %v1641_v38, %v1189_v43  ;;  %v1192_v47 = vadd.f32 %v1580_v44, %v2330_v18 }
 0x255   : > { %1336 = vst [vmem:[%s2335_s28 + $0x20] sm:$0xff] %v1286_v46  ;;  %v1289_v48 = vadd.f32 %v1644_v45, %v1192_v47  ;;  %v1581_v49 = vpop.f32.mrb[44].mxu0  ;;  %v1645_v50 = vpop.f32.mrb[44].mxu1 }
 0x256   : > { %v1582_v51 = vpop.f32.mrb[45].mxu0  ;;  %v1646_v52 = vpop.f32.mrb[45].mxu1 }
 0x257   : > { %1337 = vst [vmem:[%s2335_s28 + $0x28] sm:$0xff] %v1289_v48  ;;  %v1583_v53 = vadd.f32 %v1582_v51, %v1581_v49  ;;  %v1647_v54 = vadd.f32 %v1646_v52, %v1645_v50  ;;  %v1584_v55 = vpop.f32.mrb[46].mxu0  ;;  %v1648_v56 = vpop.f32.mrb[46].mxu1 }
 0x258   : > { %v1585_v57 = vpop.f32.mrb[47].mxu0  ;;  %v1649_v58 = vpop.f32.mrb[47].mxu1 }
 0x259   : > { %v1197_v59 = vadd.f32 %v1583_v53, %v2330_v18  ;;  %v1586_v60 = vadd.f32 %v1585_v57, %v1584_v55  ;;  %v1650_v16 = vadd.f32 %v1649_v58, %v1648_v56 }
 0x25b   : > { %v1294_v61 = vadd.f32 %v1647_v54, %v1197_v59  ;;  %v1200_v17 = vadd.f32 %v1586_v60, %v2330_v18 }
 0x25d   : > { %1338 = vst [vmem:[%s2335_s28 + $0x30] sm:$0xff] %v1294_v61  ;;  %v1297_v62 = vadd.f32 %v1650_v16, %v1200_v17  ;;  %v1587_v63 = vpop.f32.mrb[48].mxu0  ;;  %v1651_v19 = vpop.f32.mrb[48].mxu1 }
 0x25e   : > { %v1588_v1 = vpop.f32.mrb[49].mxu0  ;;  %v1652_v2 = vpop.f32.mrb[49].mxu1 }
 0x25f   : > { %1339 = vst [vmem:[%s2335_s28 + $0x38] sm:$0xff] %v1297_v62  ;;  %v1589_v3 = vadd.f32 %v1588_v1, %v1587_v63  ;;  %v1653_v4 = vadd.f32 %v1652_v2, %v1651_v19  ;;  %v1590_v5 = vpop.f32.mrb[50].mxu0  ;;  %v1654_v6 = vpop.f32.mrb[50].mxu1 }
 0x260   : > { %v1591_v7 = vpop.f32.mrb[51].mxu0  ;;  %v1655_v8 = vpop.f32.mrb[51].mxu1 }
 0x261   : > { %v1205_v9 = vadd.f32 %v1589_v3, %v2330_v18  ;;  %v1592_v10 = vadd.f32 %v1591_v7, %v1590_v5  ;;  %v1656_v11 = vadd.f32 %v1655_v8, %v1654_v6 }
 0x263   : > { %v1302_v12 = vadd.f32 %v1653_v4, %v1205_v9  ;;  %v1208_v13 = vadd.f32 %v1592_v10, %v2330_v18 }
 0x265   : > { %1340 = vst [vmem:[%s2335_s28 + $0x40] sm:$0xff] %v1302_v12  ;;  %v1305_v14 = vadd.f32 %v1656_v11, %v1208_v13  ;;  %v1593_v0 = vpop.f32.mrb[52].mxu0  ;;  %v1657_v15 = vpop.f32.mrb[52].mxu1 }
 0x266   : > { %v1594_v20 = vpop.f32.mrb[53].mxu0  ;;  %v1658_v21 = vpop.f32.mrb[53].mxu1 }
 0x267   : > { %1341 = vst [vmem:[%s2335_s28 + $0x48] sm:$0xff] %v1305_v14  ;;  %v1595_v22 = vadd.f32 %v1594_v20, %v1593_v0  ;;  %v1659_v23 = vadd.f32 %v1658_v21, %v1657_v15  ;;  %v1596_v24 = vpop.f32.mrb[54].mxu0  ;;  %v1660_v25 = vpop.f32.mrb[54].mxu1 }
 0x268   : > { %v1597_v26 = vpop.f32.mrb[55].mxu0  ;;  %v1661_v27 = vpop.f32.mrb[55].mxu1 }
 0x269   : > { %v1213_v28 = vadd.f32 %v1595_v22, %v2330_v18  ;;  %v1598_v29 = vadd.f32 %v1597_v26, %v1596_v24  ;;  %v1662_v30 = vadd.f32 %v1661_v27, %v1660_v25 }
 0x26b   : > { %v1310_v31 = vadd.f32 %v1659_v23, %v1213_v28  ;;  %v1216_v32 = vadd.f32 %v1598_v29, %v2330_v18 }
 0x26d   : > { %1342 = vst [vmem:[%s2335_s28 + $0x50] sm:$0xff] %v1310_v31  ;;  %v1313_v33 = vadd.f32 %v1662_v30, %v1216_v32  ;;  %v1599_v34 = vpop.f32.mrb[56].mxu0  ;;  %v1663_v35 = vpop.f32.mrb[56].mxu1 }
 0x26e   : > { %v1600_v36 = vpop.f32.mrb[57].mxu0  ;;  %v1664_v37 = vpop.f32.mrb[57].mxu1 }
 0x26f   : > { %1343 = vst [vmem:[%s2335_s28 + $0x58] sm:$0xff] %v1313_v33  ;;  %v1601_v38 = vadd.f32 %v1600_v36, %v1599_v34  ;;  %v1665_v39 = vadd.f32 %v1664_v37, %v1663_v35  ;;  %v1602_v40 = vpop.f32.mrb[58].mxu0  ;;  %v1666_v41 = vpop.f32.mrb[58].mxu1 }
 0x270   : > { %v1603_v42 = vpop.f32.mrb[59].mxu0  ;;  %v1667_v43 = vpop.f32.mrb[59].mxu1 }
 0x271   : > { %v1221_v44 = vadd.f32 %v1601_v38, %v2330_v18  ;;  %v1604_v45 = vadd.f32 %v1603_v42, %v1602_v40  ;;  %v1668_v46 = vadd.f32 %v1667_v43, %v1666_v41 }
 0x273   : > { %v1318_v47 = vadd.f32 %v1665_v39, %v1221_v44  ;;  %v1224_v48 = vadd.f32 %v1604_v45, %v2330_v18 }
 0x275   : > { %1344 = vst [vmem:[%s2335_s28 + $0x60] sm:$0xff] %v1318_v47  ;;  %v1321_v49 = vadd.f32 %v1668_v46, %v1224_v48  ;;  %v1605_v50 = vpop.f32.mrb[60].mxu0  ;;  %v1669_v51 = vpop.f32.mrb[60].mxu1 }
 0x276   : > { %v1606_v52 = vpop.f32.mrb[61].mxu0  ;;  %v1670_v53 = vpop.f32.mrb[61].mxu1 }
 0x277   : > { %1345 = vst [vmem:[%s2335_s28 + $0x68] sm:$0xff] %v1321_v49  ;;  %v1607_v54 = vadd.f32 %v1606_v52, %v1605_v50  ;;  %v1671_v55 = vadd.f32 %v1670_v53, %v1669_v51  ;;  %v1608_v56 = vpop.f32.mrb[62].mxu0  ;;  %v1672_v57 = vpop.f32.mrb[62].mxu1 }
 0x278   : > { %v1609_v58 = vpop.f32.mrb[63].mxu0  ;;  %v1673_v59 = vpop.f32.mrb[63].mxu1 }
 0x279   : > { %v1229_v60 = vadd.f32 %v1607_v54, %v2330_v18  ;;  %v1610_v16 = vadd.f32 %v1609_v58, %v1608_v56  ;;  %v1674_v61 = vadd.f32 %v1673_v59, %v1672_v57 }
 0x27b   : > { %v1326_v17 = vadd.f32 %v1671_v55, %v1229_v60  ;;  %v1232_v62 = vadd.f32 %v1610_v16, %v2330_v18 }
 0x27d   : > { %1346 = vst [vmem:[%s2335_s28 + $0x70] sm:$0xff] %v1326_v17  ;;  %v1329_v63 = vadd.f32 %v1674_v61, %v1232_v62 }
 0x27f   : > { %1347 = vst [vmem:[%s2335_s28 + $0x78] sm:$0xff] %v1329_v63 }
 0x280   : > { %1936 = shalt.err (!%p1933_p2)
}
 0x281   : > { %s1937_s24 = scalar_lea.hbm %s2370_s23, 2048  ;;  %s1941_s13 = scalar_lea.hbm %s2423_s5, 4096 }
 0x282   : > { %p1938_p13 = scmp.ne.s32.totalorder %s2370_s23, %s1937_s24  ;;  %p1942_p4 = scmp.lt.u32.totalorder %s2370_s23, %s2423_s5 }
 0x283   : > { %p1943_p7 = scmp.lt.u32.totalorder %s1941_s13, %s1937_s24  ;;  %p1945_p11 = scmp.lt.u32.totalorder %s1937_s24, %s2370_s23 }
 0x284   : > { %p1939_p6 = pnand %p1938_p13, %p2437_p0 }
 0x285   : > { %p1944_p8 = por %p1943_p7, %p1942_p4 }
 0x286   : > { %p1940_p10 = pneg %p1939_p6 }
 0x287   : > { %p1946_p1 = por %p1945_p11, %p1944_p8 }
 0x289   : > { %p1947_p3 = pnand %p1946_p1, %p1940_p10 }
 0x28b   : > { %1950 = shalt.err (!%p1947_p3)
}
 0x28c   : > { %s2004_s14 = smov 128   ;;  %s2005_s30 = smov 8  }
 0x28d   : > { %1685 = dma.vmem_to_hbm [thread:$0]  (%p2437_p0), %s2372_s15, 2048, %s2370_s23, %s1349_s7, %s2004_s14, %s2004_s14, %s2005_s30  }
 0x28e PF: > { %s1377_s11 = sand.u32 1, %s1981_s18   ;;  %p2438_p5 = scmp.ne.s32.totalorder %s2428_s25, 0 }
 0x28f   : > { %p2439_p9 = scmp.ge.s32.totalorder %s1993_s21, 2  ;;  %s1378_s6 = scalar_lea.sflag [#allocation4], %s1377_s11 }
 0x291   : > { %p1699_p12 = pnand %p2439_p9, %p2438_p5 }
 0x293   : > { %1976 = dma.done.wait (!%p1699_p12), %s1378_s6, 2048  }
 0x294   : > { %1978 = vsyncadd (!%p1699_p12), %s1378_s6, 4294965248  ;;  %p19_p2 = scmp.ge.s32.totalorder %s2149_s16, 4   ;;  %s2440_s18 = smov %s1985_s19 }
 0x295   : > { %s2441_s19 = smov %s1989_s20  ;;  %s2442_s20 = smov %s2158_s27 }
 0x296   : > { %s2443_s21 = smov %s2149_s16  ;;  %21 = sbr.rel (!%p19_p2) target bundleno = 6 (0x6), region = 93 }
 0x29d   :  { %1383 = vsyncpa [#allocation3], 1 }
 0x29e   :  { %1385 = vsyncpa [#allocation3 + $0x1], 1 }
 0x29f   :  { %1386 = vsyncpa [#allocation6], 1 }
 0x2a0   :  { %1387 = vsyncpa [#allocation4], 1 }
 0x2a1   :  { %1389 = vsyncpa [#allocation4 + $0x1], 1 }

</bundles_post_ra>
